<compile_context>
chip_gen: v5e
topology: v5e:2x2
jax: 0.10.0
libtpu: 0.0.40
codegen_flags: <defaults>
</compile_context>

<pallas_src>
import math

import jax
import jax.numpy as jnp
from jax.experimental import pallas as pl
from jax.experimental.pallas import tpu as pltpu


def _round_up(x, m):
    return ((x + m - 1) // m) * m


def _decoder_gelu_kernel(x_ref, w1_ref, b1_ref, w2_ref, b2_ref, o_ref):
    # x:  [TM, D_in]     w1: [D_in, H]      b1: [1, H]
    # w2: [H, D_out_p]   b2: [1, D_out_p]   o:  [TM, D_out_p]
    x = x_ref[...]

    # First linear layer (MXU matmul, f32 accumulate).
    h = jnp.dot(x, w1_ref[...], preferred_element_type=jnp.float32) + b1_ref[...]

    # Exact (erf-based) GELU in f32, matching torch.nn.GELU() default.
    inv_sqrt2 = jnp.float32(1.0 / math.sqrt(2.0))
    h = jnp.float32(0.5) * h * (jnp.float32(1.0) + jax.lax.erf(h * inv_sqrt2))

    # TODO(synk): dropout is identity here (inference mode); training-mode
    # dropout would need pltpu.prng_seed / pltpu.prng_random_bits masking of h.

    # Second linear layer (output lane-dense: D_out padded to a 128 multiple).
    out = jnp.dot(h, w2_ref[...], preferred_element_type=jnp.float32) + b2_ref[...]
    o_ref[...] = out.astype(o_ref.dtype)


def decoder_gelu_forward(x, w1, b1, w2, b2, *, row_tile=512):
    """x: [B, S, D_in]; weights stored as [in, out] (transposed vs. torch)."""
    B, S, D_in = x.shape
    H = w1.shape[1]
    D_out = w2.shape[1]
    M = B * S

    # ---- layout plumbing (plain JAX, outside the kernel) --------------------
    # Lane-dense output: pad D_out up to a multiple of 128 (avoids masked
    # vst.msk partial stores); padded columns are zero and sliced off after.
    D_out_p = _round_up(D_out, 128)
    # Row tiling: largest multiple of 8 up to `row_tile`; pad M so it divides.
    TM = min(row_tile, _round_up(M, 8))
    M_p = _round_up(M, TM)

    x2d = jnp.pad(x.reshape(M, D_in), ((0, M_p - M), (0, 0)))
    b1_2d = b1.reshape(1, H)
    w2_p = jnp.pad(w2, ((0, 0), (0, D_out_p - D_out)))
    b2_2d = jnp.pad(b2.reshape(1, D_out), ((0, 0), (0, D_out_p - D_out)))

    grid = (M_p // TM,)

    # Rough f32 VMEM budget: double-buffered x/out tiles + weights + hidden
    # intermediate, with 2x headroom; clamped to [32 MiB, 48 MiB] which is safe
    # on v5e/v6e (128 MiB) and v7x (64 MiB physical).
    itemsize = 4
    est = itemsize * (
        2 * TM * D_in
        + 2 * TM * D_out_p
        + 2 * (D_in * H + H * D_out_p + H + D_out_p)
        + TM * H
    )
    vmem_limit = int(min(max(2 * est, 32 * 1024 * 1024), 48 * 1024 * 1024))

    def run(single_buffer_weights):
        wmode = {}
        if single_buffer_weights:
            # Weight/bias block index is constant across the grid -> no need to
            # double-buffer them; halves resident weight VMEM.
            wmode = dict(pipeline_mode=pl.Buffered(1))
        in_specs = [
            pl.BlockSpec((TM, D_in), lambda i: (i, 0)),
            pl.BlockSpec((D_in, H), lambda i: (0, 0), **wmode),
            pl.BlockSpec((1, H), lambda i: (0, 0), **wmode),
            pl.BlockSpec((H, D_out_p), lambda i: (0, 0), **wmode),
            pl.BlockSpec((1, D_out_p), lambda i: (0, 0), **wmode),
        ]
        out_spec = pl.BlockSpec((TM, D_out_p), lambda i: (i, 0))
        return pl.pallas_call(
            _decoder_gelu_kernel,
            out_shape=jax.ShapeDtypeStruct((M_p, D_out_p), x.dtype),
            grid=grid,
            in_specs=in_specs,
            out_specs=out_spec,
            compiler_params=pltpu.CompilerParams(
                dimension_semantics=("parallel",),  # rows independent -> 2-TC on v7x
                vmem_limit_bytes=vmem_limit,
            ),
        )(x2d, w1, b1_2d, w2_p, b2_2d)

    try:
        out2d = run(single_buffer_weights=True)
    except Exception:
        # pl.Buffered(1) is a pure VMEM optimization; fall back to default
        # double-buffering if this jax version rejects it.
        out2d = run(single_buffer_weights=False)

    # Slice off row padding and the zero-padded output columns.
    return out2d[:M, :D_out].reshape(B, S, D_out)


def init_params(key, initial_size, output_size, dtype=jnp.float32):
    """Deterministic init mimicking torch.nn.Linear (uniform +/- 1/sqrt(fan_in))."""
    hidden_size = 2 * initial_size
    k1, k2, k3, k4 = jax.random.split(key, 4)
    bound1 = 1.0 / math.sqrt(initial_size)
    bound2 = 1.0 / math.sqrt(hidden_size)
    # Stored as [in, out] so the kernel can do x @ W directly.
    w1 = jax.random.uniform(k1, (initial_size, hidden_size), dtype, -bound1, bound1)
    b1 = jax.random.uniform(k2, (hidden_size,), dtype, -bound1, bound1)
    w2 = jax.random.uniform(k3, (hidden_size, output_size), dtype, -bound2, bound2)
    b2 = jax.random.uniform(k4, (output_size,), dtype, -bound2, bound2)
    return w1, b1, w2, b2


if __name__ == "__main__":
    # Small shapes consistent with the module's forward semantics.
    batch_size = 2
    sequence_length = 8
    initial_size = 32
    output_size = 5

    key = jax.random.PRNGKey(0)
    kx, kp = jax.random.split(key)

    x = jax.random.normal(
        kx, (batch_size, sequence_length, initial_size), dtype=jnp.float32
    )
    w1, b1, w2, b2 = init_params(kp, initial_size, output_size)

    out = decoder_gelu_forward(x, w1, b1, w2, b2)
    jax.block_until_ready(out)

    # Reference check in plain JAX (same math, unpadded).
    h_ref = x @ w1 + b1
    h_ref = 0.5 * h_ref * (1.0 + jax.lax.erf(h_ref / jnp.sqrt(2.0)))
    ref = h_ref @ w2 + b2
    assert out.shape == (batch_size, sequence_length, output_size)
    assert jnp.allclose(out, ref, atol=1e-5, rtol=1e-5)

    print("KERNEL_OK")
</pallas_src>

<mosaic_0001>
module attributes {stable_mosaic.version = 11 : i64} {
  func.func @_decoder_gelu_kernel(%arg0: i32, %arg1: memref<16x32xf32, #tpu.memory_space<vmem>>, %arg2: memref<32x64xf32, #tpu.memory_space<vmem>>, %arg3: memref<1x64xf32, #tpu.memory_space<vmem>>, %arg4: memref<64x128xf32, #tpu.memory_space<vmem>>, %arg5: memref<1x128xf32, #tpu.memory_space<vmem>>, %arg6: memref<16x128xf32, #tpu.memory_space<vmem>>) attributes {dimension_semantics = [#tpu.dimension_semantics<parallel>], iteration_bounds = array<i64: 1>, scalar_prefetch = 0 : i64, scratch_operands = 0 : i64, tpu.core_type = #tpu.core_type<tc>, window_params = [{transform_indices = @transform_0, window_bounds = array<i64: 16, 32>}, {pipeline_mode = #tpu.pipeline_mode<synchronous>, transform_indices = @transform_1, window_bounds = array<i64: 32, 64>}, {pipeline_mode = #tpu.pipeline_mode<synchronous>, transform_indices = @transform_2, window_bounds = array<i64: 1, 64>}, {pipeline_mode = #tpu.pipeline_mode<synchronous>, transform_indices = @transform_3, window_bounds = array<i64: 64, 128>}, {pipeline_mode = #tpu.pipeline_mode<synchronous>, transform_indices = @transform_4, window_bounds = array<i64: 1, 128>}, {transform_indices = @transform_5, window_bounds = array<i64: 16, 128>}]} {
    %c0 = arith.constant 0 : index
    %c0_0 = arith.constant 0 : index
    %0 = vector.load %arg1[%c0, %c0_0] : memref<16x32xf32, #tpu.memory_space<vmem>>, vector<16x32xf32>
    %c0_1 = arith.constant 0 : index
    %c0_2 = arith.constant 0 : index
    %1 = vector.load %arg2[%c0_1, %c0_2] : memref<32x64xf32, #tpu.memory_space<vmem>>, vector<32x64xf32>
    %cst = arith.constant dense<0.000000e+00> : vector<16x64xf32>
    %2 = tpu.matmul %0, %1, %cst {dimension_numbers = #tpu.dot_dimension_numbers<[1], [0], [0], [1], [0, 0, 1, 1], [], []>} : vector<16x32xf32>, vector<32x64xf32>, vector<16x64xf32> -> vector<16x64xf32>
    %c0_3 = arith.constant 0 : index
    %c0_4 = arith.constant 0 : index
    %3 = vector.load %arg3[%c0_3, %c0_4] : memref<1x64xf32, #tpu.memory_space<vmem>>, vector<1x64xf32>
    %4 = vector.broadcast %3 : vector<1x64xf32> to vector<16x64xf32>
    %5 = arith.addf %2, %4 : vector<16x64xf32>
    %cst_5 = arith.constant 5.000000e-01 : f32
    %6 = vector.broadcast %cst_5 : f32 to vector<16x64xf32>
    %7 = arith.mulf %6, %5 : vector<16x64xf32>
    %cst_6 = arith.constant 0.707106769 : f32
    %8 = vector.broadcast %cst_6 : f32 to vector<16x64xf32>
    %9 = arith.mulf %5, %8 : vector<16x64xf32>
    %10 = math.erf %9 : vector<16x64xf32>
    %cst_7 = arith.constant 1.000000e+00 : f32
    %11 = vector.broadcast %cst_7 : f32 to vector<16x64xf32>
    %12 = arith.addf %11, %10 : vector<16x64xf32>
    %13 = arith.mulf %7, %12 : vector<16x64xf32>
    %c0_8 = arith.constant 0 : index
    %c0_9 = arith.constant 0 : index
    %14 = vector.load %arg4[%c0_8, %c0_9] : memref<64x128xf32, #tpu.memory_space<vmem>>, vector<64x128xf32>
    %cst_10 = arith.constant dense<0.000000e+00> : vector<16x128xf32>
    %15 = tpu.matmul %13, %14, %cst_10 {dimension_numbers = #tpu.dot_dimension_numbers<[1], [0], [0], [1], [0, 0, 1, 1], [], []>} : vector<16x64xf32>, vector<64x128xf32>, vector<16x128xf32> -> vector<16x128xf32>
    %c0_11 = arith.constant 0 : index
    %c0_12 = arith.constant 0 : index
    %16 = vector.load %arg5[%c0_11, %c0_12] : memref<1x128xf32, #tpu.memory_space<vmem>>, vector<1x128xf32>
    %17 = vector.broadcast %16 : vector<1x128xf32> to vector<16x128xf32>
    %18 = arith.addf %15, %17 : vector<16x128xf32>
    %c0_13 = arith.constant 0 : index
    %c0_14 = arith.constant 0 : index
    %19 = vector.load %arg6[%c0_13, %c0_14] : memref<16x128xf32, #tpu.memory_space<vmem>>, vector<16x128xf32>
    tpu.vector_store %arg6[%c0_13, %c0_14], %18 {strides = array<i32>} : memref<16x128xf32, #tpu.memory_space<vmem>>, vector<16x128xf32>,
    return
  }
  func.func @transform_0(%arg0: i32) -> (i32, i32) {
    %c0_i32 = arith.constant 0 : i32
    %c0_i32_0 = arith.constant 0 : i32
    return %arg0, %c0_i32 : i32, i32
  }
  func.func @transform_1(%arg0: i32) -> (i32, i32) {
    %c0_i32 = arith.constant 0 : i32
    %c0_i32_0 = arith.constant 0 : i32
    %c0_i32_1 = arith.constant 0 : i32
    return %c0_i32, %c0_i32_0 : i32, i32
  }
  func.func @transform_2(%arg0: i32) -> (i32, i32) {
    %c0_i32 = arith.constant 0 : i32
    %c0_i32_0 = arith.constant 0 : i32
    %c0_i32_1 = arith.constant 0 : i32
    return %c0_i32, %c0_i32_0 : i32, i32
  }
  func.func @transform_3(%arg0: i32) -> (i32, i32) {
    %c0_i32 = arith.constant 0 : i32
    %c0_i32_0 = arith.constant 0 : i32
    %c0_i32_1 = arith.constant 0 : i32
    return %c0_i32, %c0_i32_0 : i32, i32
  }
  func.func @transform_4(%arg0: i32) -> (i32, i32) {
    %c0_i32 = arith.constant 0 : i32
    %c0_i32_0 = arith.constant 0 : i32
    %c0_i32_1 = arith.constant 0 : i32
    return %c0_i32, %c0_i32_0 : i32, i32
  }
  func.func @transform_5(%arg0: i32) -> (i32, i32) {
    %c0_i32 = arith.constant 0 : i32
    %c0_i32_0 = arith.constant 0 : i32
    return %arg0, %c0_i32 : i32, i32
  }
}

module attributes {stable_mosaic.version = 11 : i64} {
  func.func @_decoder_gelu_kernel(%arg0: i32, %arg1: memref<16x32xf32, #tpu.memory_space<vmem>>, %arg2: memref<32x64xf32, #tpu.memory_space<vmem>>, %arg3: memref<1x64xf32, #tpu.memory_space<vmem>>, %arg4: memref<64x128xf32, #tpu.memory_space<vmem>>, %arg5: memref<1x128xf32, #tpu.memory_space<vmem>>, %arg6: memref<16x128xf32, #tpu.memory_space<vmem>>) attributes {dimension_semantics = [#tpu.dimension_semantics<parallel>], iteration_bounds = array<i64: 1>, scalar_prefetch = 0 : i64, scratch_operands = 0 : i64, tpu.core_type = #tpu.core_type<tc>, window_params = [{transform_indices = @transform_0, window_bounds = array<i64: 16, 32>}, {pipeline_mode = #tpu.pipeline_mode<synchronous>, transform_indices = @transform_1, window_bounds = array<i64: 32, 64>}, {pipeline_mode = #tpu.pipeline_mode<synchronous>, transform_indices = @transform_2, window_bounds = array<i64: 1, 64>}, {pipeline_mode = #tpu.pipeline_mode<synchronous>, transform_indices = @transform_3, window_bounds = array<i64: 64, 128>}, {pipeline_mode = #tpu.pipeline_mode<synchronous>, transform_indices = @transform_4, window_bounds = array<i64: 1, 128>}, {transform_indices = @transform_5, window_bounds = array<i64: 16, 128>}]} {
    %c0 = arith.constant 0 : index
    %c0_0 = arith.constant 0 : index
    %0 = vector.load %arg1[%c0, %c0_0] : memref<16x32xf32, #tpu.memory_space<vmem>>, vector<16x32xf32>
    %c0_1 = arith.constant 0 : index
    %c0_2 = arith.constant 0 : index
    %1 = vector.load %arg2[%c0_1, %c0_2] : memref<32x64xf32, #tpu.memory_space<vmem>>, vector<32x64xf32>
    %cst = arith.constant dense<0.000000e+00> : vector<16x64xf32>
    %2 = tpu.matmul %0, %1, %cst {dimension_numbers = #tpu.dot_dimension_numbers<[1], [0], [0], [1], [0, 0, 1, 1], [], []>} : vector<16x32xf32>, vector<32x64xf32>, vector<16x64xf32> -> vector<16x64xf32>
    %c0_3 = arith.constant 0 : index
    %c0_4 = arith.constant 0 : index
    %3 = vector.load %arg3[%c0_3, %c0_4] : memref<1x64xf32, #tpu.memory_space<vmem>>, vector<1x64xf32>
    %4 = vector.broadcast %3 : vector<1x64xf32> to vector<16x64xf32>
    %5 = arith.addf %2, %4 : vector<16x64xf32>
    %cst_5 = arith.constant 5.000000e-01 : f32
    %6 = vector.broadcast %cst_5 : f32 to vector<16x64xf32>
    %7 = arith.mulf %6, %5 : vector<16x64xf32>
    %cst_6 = arith.constant 0.707106769 : f32
    %8 = vector.broadcast %cst_6 : f32 to vector<16x64xf32>
    %9 = arith.mulf %5, %8 : vector<16x64xf32>
    %10 = math.erf %9 : vector<16x64xf32>
    %cst_7 = arith.constant 1.000000e+00 : f32
    %11 = vector.broadcast %cst_7 : f32 to vector<16x64xf32>
    %12 = arith.addf %11, %10 : vector<16x64xf32>
    %13 = arith.mulf %7, %12 : vector<16x64xf32>
    %c0_8 = arith.constant 0 : index
    %c0_9 = arith.constant 0 : index
    %14 = vector.load %arg4[%c0_8, %c0_9] : memref<64x128xf32, #tpu.memory_space<vmem>>, vector<64x128xf32>
    %cst_10 = arith.constant dense<0.000000e+00> : vector<16x128xf32>
    %15 = tpu.matmul %13, %14, %cst_10 {dimension_numbers = #tpu.dot_dimension_numbers<[1], [0], [0], [1], [0, 0, 1, 1], [], []>} : vector<16x64xf32>, vector<64x128xf32>, vector<16x128xf32> -> vector<16x128xf32>
    %c0_11 = arith.constant 0 : index
    %c0_12 = arith.constant 0 : index
    %16 = vector.load %arg5[%c0_11, %c0_12] : memref<1x128xf32, #tpu.memory_space<vmem>>, vector<1x128xf32>
    %17 = vector.broadcast %16 : vector<1x128xf32> to vector<16x128xf32>
    %18 = arith.addf %15, %17 : vector<16x128xf32>
    %c0_13 = arith.constant 0 : index
    %c0_14 = arith.constant 0 : index
    %19 = vector.load %arg6[%c0_13, %c0_14] : memref<16x128xf32, #tpu.memory_space<vmem>>, vector<16x128xf32>
    tpu.vector_store %arg6[%c0_13, %c0_14], %18 {strides = array<i32>} : memref<16x128xf32, #tpu.memory_space<vmem>>, vector<16x128xf32>,
    return
  }
  func.func @transform_0(%arg0: i32) -> (i32, i32) {
    %c0_i32 = arith.constant 0 : i32
    %c0_i32_0 = arith.constant 0 : i32
    return %arg0, %c0_i32 : i32, i32
  }
  func.func @transform_1(%arg0: i32) -> (i32, i32) {
    %c0_i32 = arith.constant 0 : i32
    %c0_i32_0 = arith.constant 0 : i32
    %c0_i32_1 = arith.constant 0 : i32
    return %c0_i32, %c0_i32_0 : i32, i32
  }
  func.func @transform_2(%arg0: i32) -> (i32, i32) {
    %c0_i32 = arith.constant 0 : i32
    %c0_i32_0 = arith.constant 0 : i32
    %c0_i32_1 = arith.constant 0 : i32
    return %c0_i32, %c0_i32_0 : i32, i32
  }
  func.func @transform_3(%arg0: i32) -> (i32, i32) {
    %c0_i32 = arith.constant 0 : i32
    %c0_i32_0 = arith.constant 0 : i32
    %c0_i32_1 = arith.constant 0 : i32
    return %c0_i32, %c0_i32_0 : i32, i32
  }
  func.func @transform_4(%arg0: i32) -> (i32, i32) {
    %c0_i32 = arith.constant 0 : i32
    %c0_i32_0 = arith.constant 0 : i32
    %c0_i32_1 = arith.constant 0 : i32
    return %c0_i32, %c0_i32_0 : i32, i32
  }
  func.func @transform_5(%arg0: i32) -> (i32, i32) {
    %c0_i32 = arith.constant 0 : i32
    %c0_i32_0 = arith.constant 0 : i32
    return %arg0, %c0_i32 : i32, i32
  }
}

</mosaic_0001>

<bundles_post_ra>
// kernel: tpu_custom_call.1
= control target key start
LH: loop header
LB: loop body
LE: loop exit
PB: predicated region body
PF: predicated region fallthrough
CT: control target
= control target key end

     0   :  { %10 = vsyncpa [#allocation3], 0  ;;  %s488_s0 = inlined_call_operand.hbm [shape: f32[16,32], index: 0, kind: input, shape index: {}]   ;;  %s489_s1 = inlined_call_operand.hbm [shape: f32[32,64], index: 1, kind: input, shape index: {}]   ;;  %s490_s2 = inlined_call_operand.vmem [shape: f32[1,64], index: 2, kind: input, shape index: {}]   ;;  %s491_s3 = inlined_call_operand.hbm [shape: f32[64,128], index: 3, kind: input, shape index: {}]   ;;  %s492_s4 = inlined_call_operand.vmem [shape: f32[1,128], index: 4, kind: input, shape index: {}]   ;;  %s493_s5 = inlined_call_operand.hbm [shape: f32[16,128], index: 5, kind: output, shape index: {}]  }
   0x1   :  { %11 = vsyncpa [#allocation6], 0 }
   0x2   :  { %12 = vsyncpa [#allocation4], 0  ;;  %s30_s20 = sshll.u32 %s489_s1, 4  ;;  %s392_s21 = smov [#allocation5]   ;;  %s31_s20 = int_to_ptr.hbm [resolvable:$true] %s30_s20 }
   0x3   :  { %s32_s22 = sshll.u32 %s392_s21, 4  ;;  %s17_s25 = sshll.u32 %s488_s0, 4  ;;  %s33_s22 = int_to_ptr.vmem [resolvable:$true] %s32_s22  ;;  %s18_s25 = int_to_ptr.hbm [resolvable:$true] %s17_s25 }
   0x4   :  { %s393_s26 = smov 128   ;;  %s394_s27 = smov 8  }
   0x5   :  { %38 = dma.hbm_to_vmem [thread:$0]  %s31_s20, 512, %s33_s22, [#allocation6], %s393_s26, %s393_s26, %s394_s27  }
   0x6   :  { %s395_s28 = smov [#allocation2]   ;;  %s45_s1 = sshll.u32 %s491_s3, 4  ;;  %s46_s1 = int_to_ptr.hbm [resolvable:$true] %s45_s1 }
   0x7   :  { %s19_s29 = sshll.u32 %s395_s28, 4  ;;  %s396_s0 = smov [#allocation7]   ;;  %s20_s29 = int_to_ptr.vmem [resolvable:$true] %s19_s29 }
   0x8   :  { %25 = dma.hbm_to_vmem [thread:$0]  %s18_s25, 256, %s20_s29, [#allocation3], %s393_s26, %s393_s26, %s394_s27  }
   0x9   :  { %s47_s7 = sshll.u32 %s396_s0, 4  ;;  %s48_s7 = int_to_ptr.vmem [resolvable:$true] %s47_s7 }
   0xa   :  { %53 = dma.hbm_to_vmem [thread:$0]  %s46_s1, 1024, %s48_s7, [#allocation6], %s393_s26, %s393_s26, %s394_s27  }
   0xb   :  { %386 = dma.done.wait [#allocation3], 256  }
   0xc   :  { %387 = vsyncadd [#allocation3], 4294967040 }
   0xd   :  { %388 = dma.done.wait [#allocation6], 1536  }
   0xe   :  { %389 = vsyncadd [#allocation6], 4294965760  ;;  %v73_v0 = vld [vmem:[#allocation5 + $0x18] sm:$0xff]  ;;  %v72_v1 = vld [vmem:[#allocation5 + $0x10] sm:$0xff]  ;;  %vm78_vm0 = vcmask 261120   ;;  %vm208_vm9 = vcmask 523264  }
   0xf   :  { %97 = vmatpush.msra.mxu0 %v73_v0  ;;  %266 = vmatpush.msra.mxu3 %v73_v0  ;;  %v71_v2 = vld [vmem:[#allocation5 + $0x8] sm:$0xff]  ;;  %v70_v3 = vld [vmem:[#allocation5] sm:$0xff]  ;;  %v68_v4 = vld [vmem:[#allocation2] sm:$0xff]  ;;  %s397_s10 = smov [#allocation8]   ;;  %s246_s14 = sshll.u32 %s493_s5, 4  ;;  %s247_s14 = int_to_ptr.hbm [resolvable:$true] %s246_s14 }
  0x10   :  { %v69_v5 = vld [vmem:[#allocation2 + $0x8] sm:$0xff]  ;;  %v284_v6 = vld [vmem:[%s490_s2] ss:$0 sm:$0xff]  ;;  %v201_v22 = vld [vmem:[#allocation7 + $0x28] sm:$0xff]  ;;  %s244_s11 = sshll.u32 %s397_s10, 4  ;;  %s245_s11 = int_to_ptr.vmem [resolvable:$true] %s244_s11 }
  0x11   :  { %98 = vmatpush.msra.mxu0 %v72_v1  ;;  %267 = vmatpush.msra.mxu3 %v72_v1  ;;  %v203_v14 = vld [vmem:[#allocation7 + $0x38] sm:$0xff]  ;;  %v202_v18 = vld [vmem:[#allocation7 + $0x30] sm:$0xff]  ;;  %v200_v26 = vld [vmem:[#allocation7 + $0x20] sm:$0xff] }
  0x12   :  { %223 = vmatpush.msra.mxu1 %v203_v14  ;;  %270 = vmatpush.msra.mxu2 %v203_v14  ;;  %v199_v31 = vld [vmem:[#allocation7 + $0x18] sm:$0xff]  ;;  %v198_v35 = vld [vmem:[#allocation7 + $0x10] sm:$0xff]  ;;  %v197_v40 = vld [vmem:[#allocation7 + $0x8] sm:$0xff] }
  0x13   :  { %99 = vmatpush.msra.mxu0 %v71_v2  ;;  %268 = vmatpush.msra.mxu3 %v71_v2  ;;  %v196_v42 = vld [vmem:[#allocation7] sm:$0xff] }
  0x14   :  { %224 = vmatpush.msra.mxu1 %v202_v18  ;;  %271 = vmatpush.msra.mxu2 %v202_v18 }
  0x15   :  { %100 = vmatpush.msra.mxu0 %v70_v3  ;;  %269 = vmatpush.msra.mxu3 %v70_v3 }
  0x16   :  { %260 = vmatmul.msk.f32.vlgmr.msra.gmra.mxu0 %vm78_vm0, %v68_v4  ;;  %261 = vmatmul.msk.f32.vlgmr.msra.gmra.mxu3 %vm78_vm0, %v69_v5 }
  0x17   :  { %225 = vmatpush.msra.mxu1 %v201_v22  ;;  %272 = vmatpush.msra.mxu2 %v201_v22 }
  0x19   :  { %226 = vmatpush.msra.mxu1 %v200_v26  ;;  %273 = vmatpush.msra.mxu2 %v200_v26 }
  0x1b   :  { %227 = vmatpush.msra.mxu1 %v199_v31  ;;  %274 = vmatpush.msra.mxu2 %v199_v31 }
  0x1d   :  { %228 = vmatpush.msra.mxu1 %v198_v35  ;;  %275 = vmatpush.msra.mxu2 %v198_v35 }
  0x1f   :  { %229 = vmatpush.msra.mxu1 %v197_v40  ;;  %276 = vmatpush.msra.mxu2 %v197_v40 }
  0x21   :  { %230 = vmatpush.msra.mxu1 %v196_v42  ;;  %277 = vmatpush.msra.mxu2 %v196_v42 }
  0x93   :  { %v102_v7 = vpop.f32.mrf.mxu0 }
  0x94   :  { %v449_v8 = vadd.f32 %v284_v6, %v102_v7 }
  0x96   :  { %v452_v9 = vmul.f32 0.70710677, %v449_v8  ;;  %v108_v26 = vmul.f32 0.5, %v449_v8  ;;  %v285_v8 = vld [vmem:[%s492_s4] ss:$0 sm:$0xff] }
  0x98   :  { %v112_v10 = vmul.f32 %v452_v9, %v452_v9 }
  0x99   :  { %v105_v11 = vpop.f32.mrf.mxu3 }
  0x9a   :  { %v456_v12 = vmin.f32 %v112_v10, 16.0  ;;  %v458_v13 = vadd.f32 %v284_v6, %v105_v11 }
  0x9c   :  { %v114_v15 = vmul.f32 2.1237322e-06, %v456_v12  ;;  %v125_v16 = vmul.f32 3.8918573e-05, %v456_v12  ;;  %v463_v17 = vmul.f32 0.70710677, %v458_v13 }
  0x9e   :  { %v115_v19 = vadd.f32 0.00028619796, %v114_v15  ;;  %v126_v20 = vadd.f32 0.001143296, %v125_v16  ;;  %v152_v21 = vmul.f32 %v463_v17, %v463_v17 }
  0xa0   :  { %v116_v23 = vmul.f32 %v115_v19, %v456_v12  ;;  %v127_v24 = vmul.f32 %v126_v20, %v456_v12  ;;  %v153_v25 = vmin.f32 %v152_v21, 16.0 }
  0xa2   :  { %v117_v27 = vadd.f32 0.0036580483, %v116_v23  ;;  %v128_v28 = vadd.f32 0.014752088, %v127_v24  ;;  %v154_v29 = vmul.f32 2.1237322e-06, %v153_v25 }
  0xa3   :  { %v165_v30 = vmul.f32 3.8918573e-05, %v153_v25 }
  0xa4   :  { %v129_v32 = vmul.f32 %v128_v28, %v456_v12  ;;  %v155_v33 = vadd.f32 0.00028619796, %v154_v29  ;;  %v118_v37 = vmul.f32 %v117_v27, %v456_v12 }
  0xa5   :  { %v166_v34 = vadd.f32 0.001143296, %v165_v30 }
  0xa6   :  { %v130_v36 = vadd.f32 0.112945676, %v129_v32  ;;  %v156_v38 = vmul.f32 %v155_v33, %v153_v25  ;;  %v119_v46 = vadd.f32 0.05243302, %v118_v37  ;;  %v109_v33 = vmul.f32 0.5, %v458_v13 }
  0xa7   :  { %v167_v39 = vmul.f32 %v166_v34, %v153_v25 }
  0xa8   :  { %v131_v41 = vmul.f32 %v130_v36, %v456_v12  ;;  %v157_v45 = vadd.f32 0.0036580483, %v156_v38  ;;  %v120_v52 = vmul.f32 %v119_v46, %v456_v12 }
  0xa9   :  { %v168_v43 = vadd.f32 0.014752088, %v167_v39 }
  0xaa   :  { %v132_v44 = vadd.f32 0.4994258, %v131_v41  ;;  %v158_v51 = vmul.f32 %v157_v45, %v153_v25  ;;  %v121_v56 = vadd.f32 0.18741608, %v120_v52 }
  0xab   :  { %v169_v47 = vmul.f32 %v168_v43, %v153_v25 }
  0xac   :  { %v133_v48 = vmul.f32 %v132_v44, %v456_v12  ;;  %v159_v55 = vadd.f32 0.05243302, %v158_v51  ;;  %v122_v61 = vmul.f32 %v121_v56, %v456_v12 }
  0xad   :  { %v170_v49 = vadd.f32 0.112945676, %v169_v47 }
  0xae   :  { %v134_v50 = vadd.f32 1.0, %v133_v48  ;;  %v160_v60 = vmul.f32 %v159_v55, %v153_v25  ;;  %v123_v2 = vadd.f32 1.1283791, %v122_v61 }
  0xaf   :  { %v171_v53 = vmul.f32 %v170_v49, %v153_v25 }
  0xb0   :  { %286 = vrcp.f32 %v134_v50  ;;  %v146_v0 = vand.u32 2147483648, %v134_v50  ;;  %v161_v1 = vadd.f32 0.18741608, %v160_v60  ;;  %v144_v4 = vand.u32 2147483647, %v134_v50 }
  0xb1   :  { %v172_v54 = vadd.f32 0.4994258, %v171_v53  ;;  %vm140_vm2 = vweird.f32 %v134_v50  ;;  %v124_v14 = vmul.f32 %v123_v2, %v452_v9 }
  0xb2   :  { %v147_v7 = vor.u32 1.1754944e-38, %v146_v0  ;;  %v162_v10 = vmul.f32 %v161_v1, %v153_v25  ;;  %vm145_vm4 = vcmp.eq.f32.partialorder %v144_v4, 8.507059e+37 }
  0xb3   :  { %v173_v57 = vmul.f32 %v172_v54, %v153_v25 }
  0xb4   :  { %v163_v20 = vadd.f32 1.1283791, %v162_v10 }
  0xb5   :  { %v174_v58 = vadd.f32 1.0, %v173_v57 }
  0xb6   :  { %v287_v59 = vpop.eup %286  ;;  %v164_v9 = vmul.f32 %v163_v20, %v463_v17 }
  0xb7   :  { %v136_v62 = vmul.f32 %v287_v59, %v134_v50  ;;  %288 = vrcp.f32 %v174_v58  ;;  %vm141_vm1 = vweird.f32 %v287_v59  ;;  %v186_v19 = vand.u32 2147483648, %v174_v58 }
  0xb8   :  { %vm142_vm3 = vmor %vm140_vm2, %vm141_vm1  ;;  %v184_v22 = vand.u32 2147483647, %v174_v58  ;;  %vm180_vm6 = vweird.f32 %v174_v58 }
  0xb9   :  { %v137_v63 = vsub.f32 1.0, %v136_v62  ;;  %v187_v25 = vor.u32 1.1754944e-38, %v186_v19 }
  0xba   :  { %vm185_vm8 = vcmp.eq.f32.partialorder %v184_v22, 8.507059e+37 }
  0xbb   :  { %v138_v3 = vmul.f32 %v287_v59, %v137_v63 }
  0xbd   :  { %v289_v5 = vpop.eup %288  ;;  %v139_v6 = vadd.f32 %v287_v59, %v138_v3 }
  0xbe   :  { %v176_v11 = vmul.f32 %v289_v5, %v174_v58  ;;  %vm181_vm5 = vweird.f32 %v289_v5 }
  0xbf   :  { %v143_v15 = vsel %vm142_vm3, %v287_v59, %v139_v6  ;;  %vm182_vm7 = vmor %vm180_vm6, %vm181_vm5 }
  0xc0   :  { %v148_v12 = vsel %vm145_vm4, %v147_v7, %v143_v15  ;;  %v177_v16 = vsub.f32 1.0, %v176_v11 }
  0xc1   :  { %v149_v18 = vmul.f32 %v148_v12, %v124_v14 }
  0xc2   :  { %v178_v21 = vmul.f32 %v289_v5, %v177_v16 }
  0xc3   :  { %v262_v23 = vclamps-f32 %v149_v18, 1.0 }
  0xc4   :  { %v179_v24 = vadd.f32 %v289_v5, %v178_v21 }
  0xc5   :  { %v192_v27 = vadd.f32 1.0, %v262_v23 }
  0xc6   :  { %v183_v28 = vsel %vm182_vm7, %v289_v5, %v179_v24 }
  0xc7   :  { %v188_v29 = vsel %vm185_vm8, %v187_v25, %v183_v28  ;;  %v194_v30 = vmul.f32 %v192_v27, %v108_v26 }
  0xc8   :  { %v189_v31 = vmul.f32 %v188_v29, %v164_v9 }
  0xc9   :  { %264 = vmatmul.msk.f32.vlgmr.msra.gmra.mxu1 %vm208_vm9, %v194_v30 }
  0xca   :  { %v263_v32 = vclamps-f32 %v189_v31, 1.0 }
  0xcc   :  { %v193_v34 = vadd.f32 1.0, %v263_v32 }
  0xce   :  { %v195_v35 = vmul.f32 %v193_v34, %v109_v33 }
  0xd0   :  { %265 = vmatmul.msk.f32.vlgmr.msra.gmra.mxu2 %vm208_vm9, %v195_v35 }
 0x146   :  { %v232_v36 = vpop.f32.mrf.mxu1 }
 0x147   :  { %v233_v37 = vadd.f32 %v285_v8, %v232_v36 }
 0x149   :  { %238 = vst [vmem:[#allocation8] sm:$0xff] %v233_v37 }
 0x153   :  { %v235_v17 = vpop.f32.mrf.mxu2 }
 0x154   :  { %v236_v38 = vadd.f32 %v285_v8, %v235_v17 }
 0x156   :  { %239 = vst [vmem:[#allocation8 + $0x8] sm:$0xff] %v236_v38 }
 0x157   :  { %252 = dma.vmem_to_hbm [thread:$0]  %s245_s11, 256, %s247_s14, [#allocation4], %s393_s26, %s393_s26, %s394_s27  }
 0x158   :  { %390 = dma.done.wait [#allocation4], 256  }
 0x159   :  { %391 = vsyncadd [#allocation4], 4294967040 }
 0x15a   :  { %257 = vsyncpa [#allocation3], 1 }
 0x15b   :  { %258 = vsyncpa [#allocation6], 1 }
 0x15c   :  { %259 = vsyncpa [#allocation4], 1 }

// kernel: tpu_custom_call.1
= control target key start
LH: loop header
LB: loop body
LE: loop exit
PB: predicated region body
PF: predicated region fallthrough
CT: control target
= control target key end

     0   :  { %10 = vsyncpa [#allocation3], 0  ;;  %s488_s0 = inlined_call_operand.hbm [shape: f32[16,32], index: 0, kind: input, shape index: {}]   ;;  %s489_s1 = inlined_call_operand.hbm [shape: f32[32,64], index: 1, kind: input, shape index: {}]   ;;  %s490_s2 = inlined_call_operand.vmem [shape: f32[1,64], index: 2, kind: input, shape index: {}]   ;;  %s491_s3 = inlined_call_operand.hbm [shape: f32[64,128], index: 3, kind: input, shape index: {}]   ;;  %s492_s4 = inlined_call_operand.vmem [shape: f32[1,128], index: 4, kind: input, shape index: {}]   ;;  %s493_s5 = inlined_call_operand.hbm [shape: f32[16,128], index: 5, kind: output, shape index: {}]  }
   0x1   :  { %11 = vsyncpa [#allocation6], 0 }
   0x2   :  { %12 = vsyncpa [#allocation4], 0  ;;  %s30_s20 = sshll.u32 %s489_s1, 4  ;;  %s392_s21 = smov [#allocation5]   ;;  %s31_s20 = int_to_ptr.hbm [resolvable:$true] %s30_s20 }
   0x3   :  { %s32_s22 = sshll.u32 %s392_s21, 4  ;;  %s17_s25 = sshll.u32 %s488_s0, 4  ;;  %s33_s22 = int_to_ptr.vmem [resolvable:$true] %s32_s22  ;;  %s18_s25 = int_to_ptr.hbm [resolvable:$true] %s17_s25 }
   0x4   :  { %s393_s26 = smov 128   ;;  %s394_s27 = smov 8  }
   0x5   :  { %38 = dma.hbm_to_vmem [thread:$0]  %s31_s20, 512, %s33_s22, [#allocation6], %s393_s26, %s393_s26, %s394_s27  }
   0x6   :  { %s395_s28 = smov [#allocation2]   ;;  %s45_s1 = sshll.u32 %s491_s3, 4  ;;  %s46_s1 = int_to_ptr.hbm [resolvable:$true] %s45_s1 }
   0x7   :  { %s19_s29 = sshll.u32 %s395_s28, 4  ;;  %s396_s0 = smov [#allocation7]   ;;  %s20_s29 = int_to_ptr.vmem [resolvable:$true] %s19_s29 }
   0x8   :  { %25 = dma.hbm_to_vmem [thread:$0]  %s18_s25, 256, %s20_s29, [#allocation3], %s393_s26, %s393_s26, %s394_s27  }
   0x9   :  { %s47_s7 = sshll.u32 %s396_s0, 4  ;;  %s48_s7 = int_to_ptr.vmem [resolvable:$true] %s47_s7 }
   0xa   :  { %53 = dma.hbm_to_vmem [thread:$0]  %s46_s1, 1024, %s48_s7, [#allocation6], %s393_s26, %s393_s26, %s394_s27  }
   0xb   :  { %386 = dma.done.wait [#allocation3], 256  }
   0xc   :  { %387 = vsyncadd [#allocation3], 4294967040 }
   0xd   :  { %388 = dma.done.wait [#allocation6], 1536  }
   0xe   :  { %389 = vsyncadd [#allocation6], 4294965760  ;;  %v73_v0 = vld [vmem:[#allocation5 + $0x18] sm:$0xff]  ;;  %v72_v1 = vld [vmem:[#allocation5 + $0x10] sm:$0xff]  ;;  %vm78_vm0 = vcmask 261120   ;;  %vm208_vm9 = vcmask 523264  }
   0xf   :  { %97 = vmatpush.msra.mxu0 %v73_v0  ;;  %266 = vmatpush.msra.mxu3 %v73_v0  ;;  %v71_v2 = vld [vmem:[#allocation5 + $0x8] sm:$0xff]  ;;  %v70_v3 = vld [vmem:[#allocation5] sm:$0xff]  ;;  %v68_v4 = vld [vmem:[#allocation2] sm:$0xff]  ;;  %s397_s10 = smov [#allocation8]   ;;  %s246_s14 = sshll.u32 %s493_s5, 4  ;;  %s247_s14 = int_to_ptr.hbm [resolvable:$true] %s246_s14 }
  0x10   :  { %v69_v5 = vld [vmem:[#allocation2 + $0x8] sm:$0xff]  ;;  %v284_v6 = vld [vmem:[%s490_s2] ss:$0 sm:$0xff]  ;;  %v201_v22 = vld [vmem:[#allocation7 + $0x28] sm:$0xff]  ;;  %s244_s11 = sshll.u32 %s397_s10, 4  ;;  %s245_s11 = int_to_ptr.vmem [resolvable:$true] %s244_s11 }
  0x11   :  { %98 = vmatpush.msra.mxu0 %v72_v1  ;;  %267 = vmatpush.msra.mxu3 %v72_v1  ;;  %v203_v14 = vld [vmem:[#allocation7 + $0x38] sm:$0xff]  ;;  %v202_v18 = vld [vmem:[#allocation7 + $0x30] sm:$0xff]  ;;  %v200_v26 = vld [vmem:[#allocation7 + $0x20] sm:$0xff] }
  0x12   :  { %223 = vmatpush.msra.mxu1 %v203_v14  ;;  %270 = vmatpush.msra.mxu2 %v203_v14  ;;  %v199_v31 = vld [vmem:[#allocation7 + $0x18] sm:$0xff]  ;;  %v198_v35 = vld [vmem:[#allocation7 + $0x10] sm:$0xff]  ;;  %v197_v40 = vld [vmem:[#allocation7 + $0x8] sm:$0xff] }
  0x13   :  { %99 = vmatpush.msra.mxu0 %v71_v2  ;;  %268 = vmatpush.msra.mxu3 %v71_v2  ;;  %v196_v42 = vld [vmem:[#allocation7] sm:$0xff] }
  0x14   :  { %224 = vmatpush.msra.mxu1 %v202_v18  ;;  %271 = vmatpush.msra.mxu2 %v202_v18 }
  0x15   :  { %100 = vmatpush.msra.mxu0 %v70_v3  ;;  %269 = vmatpush.msra.mxu3 %v70_v3 }
  0x16   :  { %260 = vmatmul.msk.f32.vlgmr.msra.gmra.mxu0 %vm78_vm0, %v68_v4  ;;  %261 = vmatmul.msk.f32.vlgmr.msra.gmra.mxu3 %vm78_vm0, %v69_v5 }
  0x17   :  { %225 = vmatpush.msra.mxu1 %v201_v22  ;;  %272 = vmatpush.msra.mxu2 %v201_v22 }
  0x19   :  { %226 = vmatpush.msra.mxu1 %v200_v26  ;;  %273 = vmatpush.msra.mxu2 %v200_v26 }
  0x1b   :  { %227 = vmatpush.msra.mxu1 %v199_v31  ;;  %274 = vmatpush.msra.mxu2 %v199_v31 }
  0x1d   :  { %228 = vmatpush.msra.mxu1 %v198_v35  ;;  %275 = vmatpush.msra.mxu2 %v198_v35 }
  0x1f   :  { %229 = vmatpush.msra.mxu1 %v197_v40  ;;  %276 = vmatpush.msra.mxu2 %v197_v40 }
  0x21   :  { %230 = vmatpush.msra.mxu1 %v196_v42  ;;  %277 = vmatpush.msra.mxu2 %v196_v42 }
  0x93   :  { %v102_v7 = vpop.f32.mrf.mxu0 }
  0x94   :  { %v449_v8 = vadd.f32 %v284_v6, %v102_v7 }
  0x96   :  { %v452_v9 = vmul.f32 0.70710677, %v449_v8  ;;  %v108_v26 = vmul.f32 0.5, %v449_v8  ;;  %v285_v8 = vld [vmem:[%s492_s4] ss:$0 sm:$0xff] }
  0x98   :  { %v112_v10 = vmul.f32 %v452_v9, %v452_v9 }
  0x99   :  { %v105_v11 = vpop.f32.mrf.mxu3 }
  0x9a   :  { %v456_v12 = vmin.f32 %v112_v10, 16.0  ;;  %v458_v13 = vadd.f32 %v284_v6, %v105_v11 }
  0x9c   :  { %v114_v15 = vmul.f32 2.1237322e-06, %v456_v12  ;;  %v125_v16 = vmul.f32 3.8918573e-05, %v456_v12  ;;  %v463_v17 = vmul.f32 0.70710677, %v458_v13 }
  0x9e   :  { %v115_v19 = vadd.f32 0.00028619796, %v114_v15  ;;  %v126_v20 = vadd.f32 0.001143296, %v125_v16  ;;  %v152_v21 = vmul.f32 %v463_v17, %v463_v17 }
  0xa0   :  { %v116_v23 = vmul.f32 %v115_v19, %v456_v12  ;;  %v127_v24 = vmul.f32 %v126_v20, %v456_v12  ;;  %v153_v25 = vmin.f32 %v152_v21, 16.0 }
  0xa2   :  { %v117_v27 = vadd.f32 0.0036580483, %v116_v23  ;;  %v128_v28 = vadd.f32 0.014752088, %v127_v24  ;;  %v154_v29 = vmul.f32 2.1237322e-06, %v153_v25 }
  0xa3   :  { %v165_v30 = vmul.f32 3.8918573e-05, %v153_v25 }
  0xa4   :  { %v129_v32 = vmul.f32 %v128_v28, %v456_v12  ;;  %v155_v33 = vadd.f32 0.00028619796, %v154_v29  ;;  %v118_v37 = vmul.f32 %v117_v27, %v456_v12 }
  0xa5   :  { %v166_v34 = vadd.f32 0.001143296, %v165_v30 }
  0xa6   :  { %v130_v36 = vadd.f32 0.112945676, %v129_v32  ;;  %v156_v38 = vmul.f32 %v155_v33, %v153_v25  ;;  %v119_v46 = vadd.f32 0.05243302, %v118_v37  ;;  %v109_v33 = vmul.f32 0.5, %v458_v13 }
  0xa7   :  { %v167_v39 = vmul.f32 %v166_v34, %v153_v25 }
  0xa8   :  { %v131_v41 = vmul.f32 %v130_v36, %v456_v12  ;;  %v157_v45 = vadd.f32 0.0036580483, %v156_v38  ;;  %v120_v52 = vmul.f32 %v119_v46, %v456_v12 }
  0xa9   :  { %v168_v43 = vadd.f32 0.014752088, %v167_v39 }
  0xaa   :  { %v132_v44 = vadd.f32 0.4994258, %v131_v41  ;;  %v158_v51 = vmul.f32 %v157_v45, %v153_v25  ;;  %v121_v56 = vadd.f32 0.18741608, %v120_v52 }
  0xab   :  { %v169_v47 = vmul.f32 %v168_v43, %v153_v25 }
  0xac   :  { %v133_v48 = vmul.f32 %v132_v44, %v456_v12  ;;  %v159_v55 = vadd.f32 0.05243302, %v158_v51  ;;  %v122_v61 = vmul.f32 %v121_v56, %v456_v12 }
  0xad   :  { %v170_v49 = vadd.f32 0.112945676, %v169_v47 }
  0xae   :  { %v134_v50 = vadd.f32 1.0, %v133_v48  ;;  %v160_v60 = vmul.f32 %v159_v55, %v153_v25  ;;  %v123_v2 = vadd.f32 1.1283791, %v122_v61 }
  0xaf   :  { %v171_v53 = vmul.f32 %v170_v49, %v153_v25 }
  0xb0   :  { %286 = vrcp.f32 %v134_v50  ;;  %v146_v0 = vand.u32 2147483648, %v134_v50  ;;  %v161_v1 = vadd.f32 0.18741608, %v160_v60  ;;  %v144_v4 = vand.u32 2147483647, %v134_v50 }
  0xb1   :  { %v172_v54 = vadd.f32 0.4994258, %v171_v53  ;;  %vm140_vm2 = vweird.f32 %v134_v50  ;;  %v124_v14 = vmul.f32 %v123_v2, %v452_v9 }
  0xb2   :  { %v147_v7 = vor.u32 1.1754944e-38, %v146_v0  ;;  %v162_v10 = vmul.f32 %v161_v1, %v153_v25  ;;  %vm145_vm4 = vcmp.eq.f32.partialorder %v144_v4, 8.507059e+37 }
  0xb3   :  { %v173_v57 = vmul.f32 %v172_v54, %v153_v25 }
  0xb4   :  { %v163_v20 = vadd.f32 1.1283791, %v162_v10 }
  0xb5   :  { %v174_v58 = vadd.f32 1.0, %v173_v57 }
  0xb6   :  { %v287_v59 = vpop.eup %286  ;;  %v164_v9 = vmul.f32 %v163_v20, %v463_v17 }
  0xb7   :  { %v136_v62 = vmul.f32 %v287_v59, %v134_v50  ;;  %288 = vrcp.f32 %v174_v58  ;;  %vm141_vm1 = vweird.f32 %v287_v59  ;;  %v186_v19 = vand.u32 2147483648, %v174_v58 }
  0xb8   :  { %vm142_vm3 = vmor %vm140_vm2, %vm141_vm1  ;;  %v184_v22 = vand.u32 2147483647, %v174_v58  ;;  %vm180_vm6 = vweird.f32 %v174_v58 }
  0xb9   :  { %v137_v63 = vsub.f32 1.0, %v136_v62  ;;  %v187_v25 = vor.u32 1.1754944e-38, %v186_v19 }
  0xba   :  { %vm185_vm8 = vcmp.eq.f32.partialorder %v184_v22, 8.507059e+37 }
  0xbb   :  { %v138_v3 = vmul.f32 %v287_v59, %v137_v63 }
  0xbd   :  { %v289_v5 = vpop.eup %288  ;;  %v139_v6 = vadd.f32 %v287_v59, %v138_v3 }
  0xbe   :  { %v176_v11 = vmul.f32 %v289_v5, %v174_v58  ;;  %vm181_vm5 = vweird.f32 %v289_v5 }
  0xbf   :  { %v143_v15 = vsel %vm142_vm3, %v287_v59, %v139_v6  ;;  %vm182_vm7 = vmor %vm180_vm6, %vm181_vm5 }
  0xc0   :  { %v148_v12 = vsel %vm145_vm4, %v147_v7, %v143_v15  ;;  %v177_v16 = vsub.f32 1.0, %v176_v11 }
  0xc1   :  { %v149_v18 = vmul.f32 %v148_v12, %v124_v14 }
  0xc2   :  { %v178_v21 = vmul.f32 %v289_v5, %v177_v16 }
  0xc3   :  { %v262_v23 = vclamps-f32 %v149_v18, 1.0 }
  0xc4   :  { %v179_v24 = vadd.f32 %v289_v5, %v178_v21 }
  0xc5   :  { %v192_v27 = vadd.f32 1.0, %v262_v23 }
  0xc6   :  { %v183_v28 = vsel %vm182_vm7, %v289_v5, %v179_v24 }
  0xc7   :  { %v188_v29 = vsel %vm185_vm8, %v187_v25, %v183_v28  ;;  %v194_v30 = vmul.f32 %v192_v27, %v108_v26 }
  0xc8   :  { %v189_v31 = vmul.f32 %v188_v29, %v164_v9 }
  0xc9   :  { %264 = vmatmul.msk.f32.vlgmr.msra.gmra.mxu1 %vm208_vm9, %v194_v30 }
  0xca   :  { %v263_v32 = vclamps-f32 %v189_v31, 1.0 }
  0xcc   :  { %v193_v34 = vadd.f32 1.0, %v263_v32 }
  0xce   :  { %v195_v35 = vmul.f32 %v193_v34, %v109_v33 }
  0xd0   :  { %265 = vmatmul.msk.f32.vlgmr.msra.gmra.mxu2 %vm208_vm9, %v195_v35 }
 0x146   :  { %v232_v36 = vpop.f32.mrf.mxu1 }
 0x147   :  { %v233_v37 = vadd.f32 %v285_v8, %v232_v36 }
 0x149   :  { %238 = vst [vmem:[#allocation8] sm:$0xff] %v233_v37 }
 0x153   :  { %v235_v17 = vpop.f32.mrf.mxu2 }
 0x154   :  { %v236_v38 = vadd.f32 %v285_v8, %v235_v17 }
 0x156   :  { %239 = vst [vmem:[#allocation8 + $0x8] sm:$0xff] %v236_v38 }
 0x157   :  { %252 = dma.vmem_to_hbm [thread:$0]  %s245_s11, 256, %s247_s14, [#allocation4], %s393_s26, %s393_s26, %s394_s27  }
 0x158   :  { %390 = dma.done.wait [#allocation4], 256  }
 0x159   :  { %391 = vsyncadd [#allocation4], 4294967040 }
 0x15a   :  { %257 = vsyncpa [#allocation3], 1 }
 0x15b   :  { %258 = vsyncpa [#allocation6], 1 }
 0x15c   :  { %259 = vsyncpa [#allocation4], 1 }

</bundles_post_ra>
